<compile_context>
chip_gen: v7x
topology: tpu7x:2x2x1
jax: 0.10.0
libtpu: 0.0.40
codegen_flags: <defaults>
</compile_context>

<pallas_src>
import jax
import jax.numpy as jnp
from jax.experimental import pallas as pl
from jax.experimental.pallas import tpu as pltpu


# Upper bound on the per-step input slab; keeps 2x(in+out)+scratch well under
# every generation's scoped-VMEM default.
_BLOCK_BUDGET_BYTES = 2 * 1024 * 1024


# ----------------------------- Pallas kernel -----------------------------

def _psi_fwd_kernel(x_ref, o_ref, tr_ref):
    """One grid step: one (batch, channel, row-tile) slab -> bl*bl out planes.

    x_ref : (nh_t*bl, W)        raw NCHW rows of this slab
    o_ref : (bl, bl, nh_t, nw)  output planes, already in final torch order
    tr_ref: (W, nh_t)           VMEM scratch holding one transposed row-phase
    """
    bl, _, nh_t, nw = o_ref.shape
    for bh in range(bl):
        # Rows i*bl + bh of the slab: sublane-strided slice (no HBM traffic).
        rows = x_ref[pl.ds(bh, nh_t, stride=bl), :]            # (nh_t, W)
        # Transpose once so the W (lane) deinterleave below becomes a cheap
        # sublane-strided slice instead of a lane gather.
        tr_ref[...] = rows.T                                   # (W, nh_t)
        for bw in range(bl):
            sub = tr_ref[pl.ds(bw, nw, stride=bl), :]          # (nw, nh_t)
            o_ref[bh, bw] = sub.T                              # (nh_t, nw)


def _pick_nh_tile(nh, bl, w, itemsize, budget=_BLOCK_BUDGET_BYTES):
    """Output rows per grid step: full plane if it fits the budget, otherwise
    the largest multiple-of-8 divisor of nh whose slab fits."""
    if nh * bl * w * itemsize <= budget or nh % 8 != 0:
        return nh
    best = 8
    for cand in range(8, nh + 1, 8):
        if nh % cand == 0 and cand * bl * w * itemsize <= budget:
            best = cand
    return best


def psi_forward(x, block_size):
    """i-RevNet psi.forward (NCHW space-to-depth) in one Pallas pass."""
    bl = int(block_size)
    bs, d, h, w = x.shape
    assert h % bl == 0 and w % bl == 0, "spatial dims must be divisible by block_size"
    nh, nw = h // bl, w // bl

    nh_t = _pick_nh_tile(nh, bl, w, x.dtype.itemsize)
    grid = (bs, d, nh // nh_t)

    out6 = pl.pallas_call(
        _psi_fwd_kernel,
        out_shape=jax.ShapeDtypeStruct((bs, bl, bl, d, nh, nw), x.dtype),
        grid=grid,
        in_specs=[pl.BlockSpec((None, None, nh_t * bl, w),
                               lambda b, c, t: (b, c, t, 0))],
        out_specs=pl.BlockSpec((None, bl, bl, None, nh_t, nw),
                               lambda b, c, t: (b, 0, 0, c, t, 0)),
        scratch_shapes=[pltpu.VMEM((w, nh_t), x.dtype)],
        compiler_params=pltpu.CompilerParams(
            dimension_semantics=("parallel", "parallel", "parallel")),
    )(x)
    # Merging the adjacent (bl, bl, d) dims is a contiguous reshape: free.
    return out6.reshape(bs, d * bl * bl, nh, nw)


# ------------------------- pure-JAX references ---------------------------
# Exact mirrors of the torch module's reshape/permute/reshape.

def psi_forward_ref(x, bl):
    bs, d, h, w = x.shape
    nh, nw = h // bl, w // bl
    t = x.reshape(bs, d, nh, bl, nw, bl)
    t = jnp.transpose(t, (0, 3, 5, 1, 2, 4))
    return t.reshape(bs, d * bl * bl, nh, nw)


def psi_inverse_ref(y, bl):
    bs, C, h, w = y.shape
    nd = C // (bl * bl)
    t = y.reshape(bs, bl, bl, nd, h, w)
    t = jnp.transpose(t, (0, 3, 4, 1, 5, 2))
    return t.reshape(bs, nd, h * bl, w * bl)


# --------------------------------- main -----------------------------------

if __name__ == "__main__":
    BL = 2
    x = jax.random.normal(jax.random.PRNGKey(0), (2, 4, 16, 16), jnp.float32)

    fwd = jax.jit(lambda t: psi_forward(t, BL))
    y = fwd(x)
    jax.block_until_ready(y)
    assert y.shape == (2, 16, 8, 8)
    assert bool(jnp.array_equal(y, psi_forward_ref(x, BL))), "forward mismatch vs torch-order reference"

    # Round trip through the (pure-JAX) inverse permutation.
    x_rt = psi_inverse_ref(y, BL)
    assert bool(jnp.array_equal(x_rt, x)), "inverse(forward(x)) != x"

    # Non-symmetric case (d != bl, H != W) to pin the channel ordering.
    x2 = jax.random.normal(jax.random.PRNGKey(1), (2, 3, 16, 24), jnp.float32)
    y2 = jax.jit(lambda t: psi_forward(t, 2))(x2)
    jax.block_until_ready(y2)
    assert y2.shape == (2, 12, 8, 12)
    assert bool(jnp.array_equal(y2, psi_forward_ref(x2, 2)))

    # Larger block size.
    x3 = jax.random.normal(jax.random.PRNGKey(2), (1, 2, 32, 32), jnp.float32)
    y3 = jax.jit(lambda t: psi_forward(t, 4))(x3)
    jax.block_until_ready(y3)
    assert y3.shape == (1, 32, 8, 8)
    assert bool(jnp.array_equal(y3, psi_forward_ref(x3, 4)))

    print("KERNEL_OK")
</pallas_src>

<mosaic_0001>
module attributes {stable_mosaic.version = 11 : i64} {
  func.func @_psi_fwd_kernel(%arg0: i32, %arg1: i32, %arg2: i32, %arg3: memref<1x1x16x16xf32, #tpu.memory_space<vmem>>, %arg4: memref<1x2x2x1x8x8xf32, #tpu.memory_space<vmem>>, %arg5: memref<16x8xf32, #tpu.memory_space<vmem>>) attributes {dimension_semantics = [#tpu.dimension_semantics<parallel>, #tpu.dimension_semantics<parallel>, #tpu.dimension_semantics<parallel>], iteration_bounds = array<i64: 2, 4, 1>, scalar_prefetch = 0 : i64, scratch_operands = 1 : i64, tpu.core_type = #tpu.core_type<tc>, window_params = [{transform_indices = @transform_0, window_bounds = array<i64: 1, 1, 16, 16>}, {transform_indices = @transform_1, window_bounds = array<i64: 1, 2, 2, 1, 8, 8>}]} {
    %c0 = arith.constant 0 : index
    %c0_0 = arith.constant 0 : index
    %c0_1 = arith.constant 0 : index
    %c0_2 = arith.constant 0 : index
    %0 = tpu.strided_load %arg3[%c0, %c0_0, %c0_1, %c0_2] {strides = array<i32: 1, 1, 2, 1>} : memref<1x1x16x16xf32, #tpu.memory_space<vmem>>, vector<1x1x8x16xf32>
    %1 = vector.shape_cast %0 : vector<1x1x8x16xf32> to vector<8x16xf32>
    %2 = tpu.transpose %1, [1, 0] : vector<8x16xf32> -> vector<16x8xf32>
    %c0_3 = arith.constant 0 : index
    %c0_4 = arith.constant 0 : index
    %3 = vector.load %arg5[%c0_3, %c0_4] : memref<16x8xf32, #tpu.memory_space<vmem>>, vector<16x8xf32>
    tpu.vector_store %arg5[%c0_3, %c0_4], %2 {strides = array<i32>} : memref<16x8xf32, #tpu.memory_space<vmem>>, vector<16x8xf32>,
    %c0_5 = arith.constant 0 : index
    %c0_6 = arith.constant 0 : index
    %4 = tpu.strided_load %arg5[%c0_5, %c0_6] {strides = array<i32: 2, 1>} : memref<16x8xf32, #tpu.memory_space<vmem>>, vector<8x8xf32>
    %5 = tpu.transpose %4, [1, 0] : vector<8x8xf32> -> vector<8x8xf32>
    %c0_7 = arith.constant 0 : index
    %c0_8 = arith.constant 0 : index
    %c0_9 = arith.constant 0 : index
    %c0_10 = arith.constant 0 : index
    %c0_11 = arith.constant 0 : index
    %c0_12 = arith.constant 0 : index
    %6 = vector.load %arg4[%c0_7, %c0_8, %c0_9, %c0_10, %c0_11, %c0_12] : memref<1x2x2x1x8x8xf32, #tpu.memory_space<vmem>>, vector<1x1x1x1x8x8xf32>
    %7 = vector.shape_cast %6 : vector<1x1x1x1x8x8xf32> to vector<8x8xf32>
    %8 = vector.shape_cast %5 : vector<8x8xf32> to vector<1x1x1x1x8x8xf32>
    tpu.vector_store %arg4[%c0_7, %c0_8, %c0_9, %c0_10, %c0_11, %c0_12], %8 {strides = array<i32>} : memref<1x2x2x1x8x8xf32, #tpu.memory_space<vmem>>, vector<1x1x1x1x8x8xf32>,
    %c1 = arith.constant 1 : index
    %c0_13 = arith.constant 0 : index
    %9 = tpu.strided_load %arg5[%c1, %c0_13] {strides = array<i32: 2, 1>} : memref<16x8xf32, #tpu.memory_space<vmem>>, vector<8x8xf32>
    %10 = tpu.transpose %9, [1, 0] : vector<8x8xf32> -> vector<8x8xf32>
    %c0_14 = arith.constant 0 : index
    %c0_15 = arith.constant 0 : index
    %c1_16 = arith.constant 1 : index
    %c0_17 = arith.constant 0 : index
    %c0_18 = arith.constant 0 : index
    %c0_19 = arith.constant 0 : index
    %11 = vector.load %arg4[%c0_14, %c0_15, %c1_16, %c0_17, %c0_18, %c0_19] : memref<1x2x2x1x8x8xf32, #tpu.memory_space<vmem>>, vector<1x1x1x1x8x8xf32>
    %12 = vector.shape_cast %11 : vector<1x1x1x1x8x8xf32> to vector<8x8xf32>
    %13 = vector.shape_cast %10 : vector<8x8xf32> to vector<1x1x1x1x8x8xf32>
    tpu.vector_store %arg4[%c0_14, %c0_15, %c1_16, %c0_17, %c0_18, %c0_19], %13 {strides = array<i32>} : memref<1x2x2x1x8x8xf32, #tpu.memory_space<vmem>>, vector<1x1x1x1x8x8xf32>,
    %c0_20 = arith.constant 0 : index
    %c0_21 = arith.constant 0 : index
    %c1_22 = arith.constant 1 : index
    %c0_23 = arith.constant 0 : index
    %14 = tpu.strided_load %arg3[%c0_20, %c0_21, %c1_22, %c0_23] {strides = array<i32: 1, 1, 2, 1>} : memref<1x1x16x16xf32, #tpu.memory_space<vmem>>, vector<1x1x8x16xf32>
    %15 = vector.shape_cast %14 : vector<1x1x8x16xf32> to vector<8x16xf32>
    %16 = tpu.transpose %15, [1, 0] : vector<8x16xf32> -> vector<16x8xf32>
    %c0_24 = arith.constant 0 : index
    %c0_25 = arith.constant 0 : index
    %17 = vector.load %arg5[%c0_24, %c0_25] : memref<16x8xf32, #tpu.memory_space<vmem>>, vector<16x8xf32>
    tpu.vector_store %arg5[%c0_24, %c0_25], %16 {strides = array<i32>} : memref<16x8xf32, #tpu.memory_space<vmem>>, vector<16x8xf32>,
    %c0_26 = arith.constant 0 : index
    %c0_27 = arith.constant 0 : index
    %18 = tpu.strided_load %arg5[%c0_26, %c0_27] {strides = array<i32: 2, 1>} : memref<16x8xf32, #tpu.memory_space<vmem>>, vector<8x8xf32>
    %19 = tpu.transpose %18, [1, 0] : vector<8x8xf32> -> vector<8x8xf32>
    %c0_28 = arith.constant 0 : index
    %c1_29 = arith.constant 1 : index
    %c0_30 = arith.constant 0 : index
    %c0_31 = arith.constant 0 : index
    %c0_32 = arith.constant 0 : index
    %c0_33 = arith.constant 0 : index
    %20 = vector.load %arg4[%c0_28, %c1_29, %c0_30, %c0_31, %c0_32, %c0_33] : memref<1x2x2x1x8x8xf32, #tpu.memory_space<vmem>>, vector<1x1x1x1x8x8xf32>
    %21 = vector.shape_cast %20 : vector<1x1x1x1x8x8xf32> to vector<8x8xf32>
    %22 = vector.shape_cast %19 : vector<8x8xf32> to vector<1x1x1x1x8x8xf32>
    tpu.vector_store %arg4[%c0_28, %c1_29, %c0_30, %c0_31, %c0_32, %c0_33], %22 {strides = array<i32>} : memref<1x2x2x1x8x8xf32, #tpu.memory_space<vmem>>, vector<1x1x1x1x8x8xf32>,
    %c1_34 = arith.constant 1 : index
    %c0_35 = arith.constant 0 : index
    %23 = tpu.strided_load %arg5[%c1_34, %c0_35] {strides = array<i32: 2, 1>} : memref<16x8xf32, #tpu.memory_space<vmem>>, vector<8x8xf32>
    %24 = tpu.transpose %23, [1, 0] : vector<8x8xf32> -> vector<8x8xf32>
    %c0_36 = arith.constant 0 : index
    %c1_37 = arith.constant 1 : index
    %c1_38 = arith.constant 1 : index
    %c0_39 = arith.constant 0 : index
    %c0_40 = arith.constant 0 : index
    %c0_41 = arith.constant 0 : index
    %25 = vector.load %arg4[%c0_36, %c1_37, %c1_38, %c0_39, %c0_40, %c0_41] : memref<1x2x2x1x8x8xf32, #tpu.memory_space<vmem>>, vector<1x1x1x1x8x8xf32>
    %26 = vector.shape_cast %25 : vector<1x1x1x1x8x8xf32> to vector<8x8xf32>
    %27 = vector.shape_cast %24 : vector<8x8xf32> to vector<1x1x1x1x8x8xf32>
    tpu.vector_store %arg4[%c0_36, %c1_37, %c1_38, %c0_39, %c0_40, %c0_41], %27 {strides = array<i32>} : memref<1x2x2x1x8x8xf32, #tpu.memory_space<vmem>>, vector<1x1x1x1x8x8xf32>,
    return
  }
  func.func @transform_0(%arg0: i32, %arg1: i32, %arg2: i32) -> (i32, i32, i32, i32) {
    %c0_i32 = arith.constant 0 : i32
    %c0_i32_0 = arith.constant 0 : i32
    return %arg0, %arg1, %arg2, %c0_i32 : i32, i32, i32, i32
  }
  func.func @transform_1(%arg0: i32, %arg1: i32, %arg2: i32) -> (i32, i32, i32, i32, i32, i32) {
    %c0_i32 = arith.constant 0 : i32
    %c0_i32_0 = arith.constant 0 : i32
    %c0_i32_1 = arith.constant 0 : i32
    %c0_i32_2 = arith.constant 0 : i32
    return %arg0, %c0_i32, %c0_i32_0, %arg1, %arg2, %c0_i32_1 : i32, i32, i32, i32, i32, i32
  }
}

</mosaic_0001>

<bundles_post_ra>
// kernel: _lambda_.1
= control target key start
LH: loop header
LB: loop body
LE: loop exit
PB: predicated region body
PF: predicated region fallthrough
CT: control target
= control target key end

     0   :  { %6 = vsyncpa [#allocation4], 0  ;;  %s894_s0 = inlined_call_operand.hbm [shape: f32[2,4,16,16], index: 0, kind: input, shape index: {}]   ;;  %s895_s1 = inlined_call_operand.vmem [shape: f32[2,2,2,4,8,8], index: 1, kind: output, shape index: {}]  }
   0x1   :  { %8 = vsyncpa [#allocation4 + $0x1], 0  ;;  %s720_s6 = smov 0   ;;  %s722_s7 = smov 0  }
   0x2   :  { %s724_s8 = smov 0   ;;  %s726_s9 = smov 0  }
   0x3   :  { %s728_s10 = smov 0   ;;  %s730_s11 = smov 0  }
   0x4   :  { %s732_s12 = smov 0   ;;  %s734_s13 = smov 0  }
   0x5 LB: > { %s515_s14 = sadd.s32 4294967295, %s705_s13   ;;  %s29_s15 = sadd.s32 1, %s697_s11  ;;  %s705_s13 = sphi %s734_s13, %s14_s13   ;;  %s701_s12 = sphi %s732_s12, %s908_s12   ;;  %s697_s11 = sphi %s730_s11, %s907_s11   ;;  %s693_s10 = sphi %s728_s10, %s906_s10   ;;  %s689_s9 = sphi %s726_s9, %s905_s9   ;;  %s685_s8 = sphi %s724_s8, %s904_s8   ;;  %s681_s7 = sphi %s722_s7, %s903_s7   ;;  %s677_s6 = sphi %s720_s6, %s902_s6  }
   0x6   : > { %p31_p0 = scmp.ge.s32.totalorder %s29_s15, 4  ;;  %s33_s16 = sadd.s32 1, %s701_s12 }
   0x7   : > { %s44_s17 = sadd.s32 1, %s685_s8  ;;  %p51_p1 = scmp.ne.s32.totalorder %s685_s8, %s681_s7 }
   0x8   : > { %s910_s15 = smov (%p31_p0, %s29_s15), 0  ;;  %s912_s16 = smov (!%p31_p0, %s33_s16), %s701_s12 }
   0x9   : > { %s38_s18 = ssub.s32 %s697_s11, %s910_s15  ;;  %p52_p2 = scmp.eq.s32.totalorder %s705_s13, 0 }
   0xa   : > { %p35_p3 = scmp.ge.s32.totalorder %s912_s16, 2  ;;  %p57_p4 = scmp.ne.s32.totalorder %s681_s7, %s677_s6 }
   0xb   : > { %p774_p5 = por %p52_p2, %p51_p1  ;;  %p58_p6 = scmp.eq.s32.totalorder %s515_s14, 0 }
   0xc   : > { %s914_s16 = smov (%p35_p3, %s912_s16), 0  ;;  %p85_p8 = scmp.eq.s32.totalorder %s515_s14, 7 }
   0xd   : > { %p780_p7 = por %p58_p6, %p57_p4  ;;  %s37_s21 = ssub.s32 %s701_s12, %s914_s16 }
   0xe   : > { %s39_s22 = sor.u32 %s38_s18, %s37_s21  ;;  %p789_p9 = por %p85_p8, %p51_p1 }
   0xf   : > { %p42_p10 = scmp.eq.s32.totalorder %s39_s22, 0  ;;  %p541_p11 = scmp.lt.s32.totalorder %s705_s13, 8 }
  0x10   : > { %s898_s23 = scalar_select %p789_p9, 1, 0 }
  0x11   : > { %s111_s24 = sand.u32 1, %s685_s8   ;;  %s520_s25 = sshll.u32 %s697_s11, 1 }
  0x12   : > { %s797_s26 = scalar_select %p42_p10, %s685_s8, %s44_s17  }
  0x13   : > { %s519_s27 = sshll.u32 %s111_s24, 4  ;;  %s521_s28 = sshll.u32 %s701_s12, 3 }
  0x14   : > { %s123_s29 = sadd.s32 %s521_s28, %s520_s25  ;;  %s115_s30 = scalar_lea.vmem [#allocation3], %s519_s27 }
  0x15   : > { %s126_s2 = sshll.u32 %s115_s30, 4  ;;  %s522_s3 = sshll.u32 %s123_s29, 7  ;;  %s800_s2 = int_to_ptr.vmem [resolvable:$true] %s126_s2 }
  0x16   : > { %s805_s6 = scalar_lea.hbm %s894_s0, %s522_s3  ;;  %p809_p12 = pnand %p541_p11, %p774_p5 }
  0x17   : > { %s814_s17 = scalar_lea.sflag [#allocation4], %s111_s24  ;;  %s609_s18 = scalar_lea.hbm %s805_s6, 256 }
  0x18   : > { %p610_p0 = scmp.ne.s32.totalorder %s805_s6, %s609_s18  ;;  %p611_p1 = pneg %p809_p12 }
  0x19   : > { %s614_s22 = scalar_lea.hbm %s894_s0, 2048  ;;  %p615_p4 = scmp.lt.u32.totalorder %s805_s6, %s894_s0 }
  0x1a   : > { %p612_p2 = pnand %p611_p1, %p610_p0  ;;  %p616_p5 = scmp.lt.u32.totalorder %s614_s22, %s609_s18 }
  0x1b   : > { %p618_p8 = scmp.lt.u32.totalorder %s609_s18, %s805_s6 }
  0x1c   : > { %p613_p3 = pneg %p612_p2  ;;  %p617_p6 = por %p616_p5, %p615_p4 }
  0x1e   : > { %p619_p10 = por %p618_p8, %p617_p6 }
  0x20   : > { %p620_p11 = pnand %p619_p10, %p613_p3 }
  0x22   : > { %623 = shalt.err (!%p620_p11)
}
  0x23   : > { %s624_s24 = scalar_lea.vmem %s800_s2, 256  ;;  %s707_s28 = smov [#allocation3]  }
  0x24   : > { %p625_p0 = scmp.ne.s32.totalorder %s800_s2, %s624_s24  ;;  %s629_s29 = sshll.u32 %s707_s28, 4  ;;  %s630_s29 = int_to_ptr.vmem [resolvable:$false] %s629_s29 }
  0x25   : > { %s631_s30 = scalar_lea.vmem %s630_s29, 512  ;;  %p632_p9 = scmp.lt.s32.totalorder %s800_s2, %s630_s29 }
  0x26   : > { %p627_p2 = pnand %p625_p0, %p611_p1  ;;  %p633_p4 = scmp.lt.s32.totalorder %s631_s30, %s624_s24 }
  0x28   : > { %p628_p13 = pneg %p627_p2  ;;  %p634_p5 = por %p633_p4, %p632_p9 }
  0x2a   : > { %p635_p6 = pnand %p634_p5, %p628_p13 }
  0x2c   : > { %638 = shalt.err (!%p635_p6)
}
  0x2d   : > { %s708_s3 = smov 128   ;;  %s709_s4 = smov 8  }
  0x2e   : > { %540 = dma.hbm_to_vmem [thread:$0]  (!%p809_p12), %s805_s6, 256, %s800_s2, %s814_s17, %s708_s3, %s708_s3, %s709_s4  }
  0x2f   : > { %p134_p1 = scmp.lt.s32.totalorder %s705_s13, 9  ;;  %p900_p3 = scmp.ge.s32.totalorder %s705_s13, 1 }
  0x31   : > { %p135_p8 = pnand %p900_p3, %p134_p1 }
  0x32   : > { %s846_s5 = sand.u32 (!%p135_p8), 1, %s681_s7  }
  0x33   : > { %138 = sbr.rel (%p135_p8) target bundleno = 347 (0x15b), region = 24  ;;  %s524_s18 = sshll.u32 (!%p135_p8), %s846_s5, 4 }
  0x34   : > { %s141_s19 = scalar_lea.sflag (!%p135_p8), [#allocation4], %s846_s5  ;;  %s144_s21 = scalar_lea.vmem (!%p135_p8), [#allocation3], %s524_s18 }
  0x3a   : > { %672 = dma.done.wait (%p780_p7), %s141_s19, 256  }
  0x3b   : > { %674 = vsyncadd (%p780_p7), %s141_s19, 4294967040  ;;  %v163_v0 = vld [vmem:[%s144_s21] ss:$2 sm:$0xff]  ;;  %v527_v1 = vld [vmem:[%s144_s21 + $0x1] ss:$2 sm:$0xff]  ;;  %vm196_vm0 = vcmask 64512  }
  0x3c   : > { %164 = vxpose.xlu0.b32.start.end [1/1] (short) (narrow) %v163_v0, 16  ;;  %s525_s20 = sshll.u32 %s846_s5, 5  ;;  %p901_p7 = scmp.ne.s32.totalorder %s898_s23, 0 }
  0x3d   : > { %s161_s2 = scalar_lea.vmem [#allocation5], %s525_s20  ;;  %s531_s6 = sshll.u32 (%p901_p7), %s693_s10, 4 }
  0x3e   : > { %s384_s14 = sadd.s32 (%p901_p7), %s689_s9, %s531_s6 }
  0x3f   : > { %s532_s17 = sshll.u32 (%p901_p7), %s384_s14, 3 }
  0x40   : > { %s386_s27 = scalar_lea.vmem (%p901_p7), %s895_s1, %s532_s17 }
  0x41   : > { %271 = vxpose.xlu0.b32.start.end [1/1] (short) (narrow) %v527_v1, 16 }
  0xbc   : > { %v180_v2 = vpop.trf.xlu0 }
  0xbd   : > { %197 = vst.msk [vmem:[#allocation2] sm:$0xff] %vm196_vm0, %v180_v2 }
  0xc0   : > { %v181_v3 = vpop.trf.xlu0 }
  0xc1   : > { %198 = vst.msk [vmem:[#allocation2 + $0x8] sm:$0xff] %vm196_vm0, %v181_v3 }
  0xc4   : > { %v287_v4 = vpop.trf.xlu0 }
  0xc8   : > { %v288_v5 = vpop.trf.xlu0  ;;  %v199_v6 = vld [vmem:[#allocation2] ss:$2 sm:$0xff]  ;;  %v234_v7 = vld [vmem:[#allocation2 + $0x1] ss:$2 sm:$0xff] }
  0xc9   : > { %200 = vxpose.xlu1.b32.start.end [1/1] (short) (narrow) %v199_v6, 8  ;;  %303 = vst.msk [vmem:[#allocation2] sm:$0xff] %vm196_vm0, %v287_v4  ;;  %304 = vst.msk [vmem:[#allocation2 + $0x8] sm:$0xff] %vm196_vm0, %v288_v5 }
  0xcd   : > { %235 = vxpose.xlu1.b32.start.end [1/1] (short) (narrow) %v234_v7, 8 }
  0xd0   : > { %v340_v8 = vld [vmem:[#allocation2 + $0x1] ss:$2 sm:$0xff]  ;;  %v305_v9 = vld [vmem:[#allocation2] ss:$2 sm:$0xff] }
  0xd1   : > { %341 = vxpose.xlu0.b32.start.end [1/1] (short) (narrow) %v340_v8, 8  ;;  %306 = vxpose.xlu1.b32.start.end [1/1] (short) (narrow) %v305_v9, 8 }
 0x149   : > { %v216_v10 = vpop.trf.xlu1 }
 0x14a   : > { %232 = vst.msk [vmem:[%s161_s2] sm:$0xff] %vm196_vm0, %v216_v10 }
 0x14c   : > { %381 = sbr.rel (!%p901_p7) target bundleno = 347 (0x15b), region = 32 }
 0x14d   : > { %v251_v11 = vpop.trf.xlu1 }
 0x14e   : > { %526 = vst.msk [vmem:[%s161_s2 + $0x8] sm:$0xff] %vm196_vm0, %v251_v11 }
 0x151   : > { %v357_v12 = vpop.trf.xlu0  ;;  %v322_v13 = vpop.trf.xlu1  ;;  %v420_v14 = vld [vmem:[%s161_s2] sm:$0xff] (%p901_p7) }
 0x152   : > { %529 = vst.msk [vmem:[%s161_s2 + $0x18] sm:$0xff] %vm196_vm0, %v357_v12  ;;  %528 = vst.msk [vmem:[%s161_s2 + $0x10] sm:$0xff] %vm196_vm0, %v322_v13 }
 0x153   : > { %421 = vst [vmem:[%s386_s27] sm:$0xff] %v420_v14 }
 0x155   : > { %v422_v15 = vld [vmem:[%s161_s2 + $0x8] sm:$0xff] }
 0x156   : > { %423 = vst [vmem:[%s386_s27 + $0x20] sm:$0xff] %v422_v15 }
 0x159   : > { %v424_v16 = vld [vmem:[%s161_s2 + $0x10] sm:$0xff]  ;;  %v426_v17 = vld [vmem:[%s161_s2 + $0x18] sm:$0xff] }
 0x15a   : > { %425 = vst [vmem:[%s386_s27 + $0x40] sm:$0xff] %v424_v16  ;;  %427 = vst [vmem:[%s386_s27 + $0x60] sm:$0xff] %v426_v17 }
 0x15b PF: > { %s14_s13 = sadd.s32 1, %s705_s13   ;;  %s902_s6 = smov %s681_s7 }
 0x15c   : > { %p11_p9 = scmp.ge.s32.totalorder %s14_s13, 10   ;;  %s903_s7 = smov %s685_s8 }
 0x15d   : > { %s904_s8 = smov %s797_s26  ;;  %s905_s9 = smov %s697_s11 }
 0x15e   : > { %s906_s10 = smov %s701_s12  ;;  %s907_s11 = smov %s910_s15 }
 0x15f   : > { %s908_s12 = smov %s914_s16  ;;  %13 = sbr.rel (!%p11_p9) target bundleno = 5 (0x5), region = 107 }
 0x166   :  { %443 = vsyncpa [#allocation4], 1 }
 0x167   :  { %445 = vsyncpa [#allocation4 + $0x1], 1 }

</bundles_post_ra>
